<compile_context>
chip_gen: v7x
topology: tpu7x:2x2x1
jax: 0.10.0
libtpu: 0.0.40
codegen_flags: <defaults>
</compile_context>

<pallas_src>
import functools

import jax
import jax.numpy as jnp
from jax import lax
from jax.experimental import pallas as pl
from jax.experimental.pallas import tpu as pltpu


# ---------------------------------------------------------------------------
# Pallas kernel: one batch element per grid step.
# ---------------------------------------------------------------------------
def _decom_loss_kernel(in_low_ref, in_high_ref, r_low_ref, i_low_ref,
                       r_high_ref, i_high_ref, out_ref, *, inv_chw, inv_hw):
    f32 = jnp.float32
    in_low = in_low_ref[0].astype(f32)       # (C, H, W)
    in_high = in_high_ref[0].astype(f32)
    r_low = r_low_ref[0].astype(f32)
    r_high = r_high_ref[0].astype(f32)
    i_low = i_low_ref[0, 0].astype(f32)      # (H, W)
    i_high = i_high_ref[0, 0].astype(f32)
    h, w = i_low.shape

    # Forward-difference wrap masks derived from rolled iotas, so the result
    # is correct for either rotation-direction convention: a position only
    # counts if its rolled partner is an adjacent pixel; the circular-wrap
    # position is zeroed, matching the reference's zero-padded last row/col.
    col = lax.broadcasted_iota(jnp.int32, (h, w), 1)
    row = lax.broadcasted_iota(jnp.int32, (h, w), 0)
    mask_w = (jnp.abs(pltpu.roll(col, shift=w - 1, axis=1) - col) == 1).astype(f32)
    mask_h = (jnp.abs(pltpu.roll(row, shift=h - 1, axis=0) - row) == 1).astype(f32)

    def grad_w(x):   # |x[:, j+1] - x[:, j]|, last column zeroed
        return mask_w * jnp.abs(pltpu.roll(x, shift=w - 1, axis=1) - x)

    def grad_h(x):   # |x[i+1, :] - x[i, :]|, last row zeroed
        return mask_h * jnp.abs(pltpu.roll(x, shift=h - 1, axis=0) - x)

    # --- terms over the full (C, H, W) images: one fused, pre-scaled pass.
    full_terms = (
        (jnp.abs(r_low * i_low - in_low)                  # recon_loss_low  (w=1.0)
         + jnp.abs(r_high * i_high - in_high)) * inv_chw  # recon_loss_high (w=1.0)
        + jnp.abs(r_low - r_high) * (0.01 * inv_chw))     # equal_R_loss    (w=0.01)

    # --- illumination-map gradients, computed once and reused.
    gx_low, gy_low = grad_w(i_low), grad_h(i_low)
    gx_high, gy_high = grad_w(i_high), grad_h(i_high)

    gx = gx_low + gx_high                                 # mutual_i_loss2
    gy = gy_low + gy_high
    mutual = gx * jnp.exp(-10.0 * gx) + gy * jnp.exp(-10.0 * gy)

    gray_low = jnp.mean(in_low, axis=0)                   # (H, W)
    gray_high = jnp.mean(in_high, axis=0)
    # Gradient-ratio division -> EUP approximate reciprocal (denom >= 0.01).
    in_high_term = (                                      # mutual_i_input_loss2(I_high, in_high)
        gx_high * pl.reciprocal(jnp.maximum(grad_w(gray_high), 0.01), approx=True)
        + gy_high * pl.reciprocal(jnp.maximum(grad_h(gray_high), 0.01), approx=True))
    in_low_term = (                                       # mutual_i_input_loss2(I_low, in_low)
        gx_low * pl.reciprocal(jnp.maximum(grad_w(gray_low), 0.01), approx=True)
        + gy_low * pl.reciprocal(jnp.maximum(grad_h(gray_low), 0.01), approx=True))

    imap_terms = (mutual * (0.2 * inv_hw)
                  + in_high_term * (0.02 * inv_hw)
                  + in_low_term * (0.15 * inv_hw))

    partial = jnp.sum(full_terms) + jnp.sum(imap_terms)
    out_ref[...] = jnp.broadcast_to(partial, out_ref.shape)


# ---------------------------------------------------------------------------
# Wrapper
# ---------------------------------------------------------------------------
def decom_loss(input_low, input_high, r_low, i_low, r_high, i_high):
    """Pallas TPU forward pass equivalent to decom_loss.forward(...)."""
    n, c, h, w = input_low.shape
    assert input_high.shape == (n, c, h, w)
    assert r_low.shape == (n, c, h, w) and r_high.shape == (n, c, h, w)
    assert i_low.shape == (n, 1, h, w) and i_high.shape == (n, 1, h, w)
    assert h > 2 and w > 2, "wrap-mask construction needs H, W > 2"

    # Per-term 1/count so per-image partial sums add up to the global means.
    inv_chw = 1.0 / float(n * c * h * w)   # recon / equal_R terms
    inv_hw = 1.0 / float(n * h * w)        # illumination-map terms
    kernel = functools.partial(_decom_loss_kernel, inv_chw=inv_chw, inv_hw=inv_hw)

    img_spec = pl.BlockSpec((1, c, h, w), lambda b: (b, 0, 0, 0))
    imap_spec = pl.BlockSpec((1, 1, h, w), lambda b: (b, 0, 0, 0))
    out_spec = pl.BlockSpec((1, 8, 128), lambda b: (b, 0, 0))

    # Explicit VMEM budget: double-buffered input blocks + f32 working copies
    # + elementwise temporaries; floored at 16 MiB / capped at 64 MiB so the
    # same setting is valid on v5e / v6e / v7x.
    in_block_bytes = sum(
        x.dtype.itemsize * cc * h * w
        for x, cc in ((input_low, c), (input_high, c), (r_low, c),
                      (r_high, c), (i_low, 1), (i_high, 1)))
    f32_work_bytes = (6 * c + 24) * h * w * 4   # rough bound on f32 temporaries
    vmem_limit = int(min(max(2 * in_block_bytes + f32_work_bytes + (1 << 20),
                             16 << 20), 64 << 20))

    partials = pl.pallas_call(
        kernel,
        out_shape=jax.ShapeDtypeStruct((n, 8, 128), jnp.float32),
        grid=(n,),
        in_specs=[img_spec, img_spec, img_spec, imap_spec, img_spec, imap_spec],
        out_specs=out_spec,
        compiler_params=pltpu.CompilerParams(
            dimension_semantics=("parallel",),
            vmem_limit_bytes=vmem_limit),
    )(input_low, input_high, r_low, i_low, r_high, i_high)

    # Tiny final reduction over the per-image partial sums in plain JAX.
    return jnp.sum(partials[:, 0, 0])


# ---------------------------------------------------------------------------
# Pure-JAX reference (mirrors the PyTorch module) for the self-check.
# ---------------------------------------------------------------------------
def _grad_w_ref(x):
    d = x[..., 1:] - x[..., :-1]
    zero = jnp.zeros(x.shape[:-1] + (1,), x.dtype)
    return jnp.abs(jnp.concatenate([d, zero], axis=-1))


def _grad_h_ref(x):
    d = x[..., 1:, :] - x[..., :-1, :]
    zero = jnp.zeros(x.shape[:-2] + (1, x.shape[-1]), x.dtype)
    return jnp.abs(jnp.concatenate([d, zero], axis=-2))


def _mutual_i_loss_ref(i_low, i_high):
    gx = _grad_w_ref(i_low) + _grad_w_ref(i_high)
    gy = _grad_h_ref(i_low) + _grad_h_ref(i_high)
    return jnp.mean(gx * jnp.exp(-10.0 * gx) + gy * jnp.exp(-10.0 * gy))


def _mutual_i_input_loss_ref(i_map, im):
    gray = jnp.mean(im, axis=1, keepdims=True)
    x_loss = jnp.abs(_grad_w_ref(i_map) / jnp.maximum(_grad_w_ref(gray), 0.01))
    y_loss = jnp.abs(_grad_h_ref(i_map) / jnp.maximum(_grad_h_ref(gray), 0.01))
    return jnp.mean(x_loss + y_loss)


def decom_loss_reference(input_low, input_high, r_low, i_low, r_high, i_high):
    recon_low = jnp.mean(jnp.abs(r_low * i_low - input_low))
    recon_high = jnp.mean(jnp.abs(r_high * i_high - input_high))
    equal_r = jnp.mean(jnp.abs(r_low - r_high))
    i_mutual = _mutual_i_loss_ref(i_low, i_high)
    i_in_high = _mutual_i_input_loss_ref(i_high, input_high)
    i_in_low = _mutual_i_input_loss_ref(i_low, input_low)
    return (recon_high * 1.0 + recon_low * 1.0 + equal_r * 0.01
            + i_mutual * 0.2 + i_in_high * 0.02 + i_in_low * 0.15)


# ---------------------------------------------------------------------------
# Demo / self-check
# ---------------------------------------------------------------------------
if __name__ == "__main__":
    key = jax.random.PRNGKey(0)
    k = jax.random.split(key, 6)

    # Small but TPU-friendly shapes: W on the lane dim (multiple of 128),
    # H on the sublane dim (multiple of 8).
    N, C, H, W = 2, 3, 16, 128
    input_low = jax.random.uniform(k[0], (N, C, H, W), jnp.float32)
    input_high = jax.random.uniform(k[1], (N, C, H, W), jnp.float32)
    R_low = jax.random.uniform(k[2], (N, C, H, W), jnp.float32)
    I_low = jax.random.uniform(k[3], (N, 1, H, W), jnp.float32)
    R_high = jax.random.uniform(k[4], (N, C, H, W), jnp.float32)
    I_high = jax.random.uniform(k[5], (N, 1, H, W), jnp.float32)

    loss = decom_loss(input_low, input_high, R_low, I_low, R_high, I_high)
    loss = jax.block_until_ready(loss)

    ref = decom_loss_reference(input_low, input_high, R_low, I_low, R_high, I_high)
    ref = jax.block_until_ready(ref)

    assert jnp.isfinite(loss), "loss is not finite"
    # Tolerance leaves room for the EUP approximate reciprocal in the
    # gradient-ratio terms.
    assert jnp.allclose(loss, ref, rtol=5e-3, atol=5e-3), (loss, ref)

    print("KERNEL_OK")
</pallas_src>

<mosaic_0001>
module attributes {stable_mosaic.version = 11 : i64} {
  func.func @_decom_loss_kernel(%arg0: i32, %arg1: memref<1x3x16x128xf32, #tpu.memory_space<vmem>>, %arg2: memref<1x3x16x128xf32, #tpu.memory_space<vmem>>, %arg3: memref<1x3x16x128xf32, #tpu.memory_space<vmem>>, %arg4: memref<1x1x16x128xf32, #tpu.memory_space<vmem>>, %arg5: memref<1x3x16x128xf32, #tpu.memory_space<vmem>>, %arg6: memref<1x1x16x128xf32, #tpu.memory_space<vmem>>, %arg7: memref<1x8x128xf32, #tpu.memory_space<vmem>>) attributes {dimension_semantics = [#tpu.dimension_semantics<parallel>], iteration_bounds = array<i64: 2>, scalar_prefetch = 0 : i64, scratch_operands = 0 : i64, tpu.core_type = #tpu.core_type<tc>, window_params = [{transform_indices = @transform_0, window_bounds = array<i64: 1, 3, 16, 128>}, {transform_indices = @transform_1, window_bounds = array<i64: 1, 3, 16, 128>}, {transform_indices = @transform_2, window_bounds = array<i64: 1, 3, 16, 128>}, {transform_indices = @transform_3, window_bounds = array<i64: 1, 1, 16, 128>}, {transform_indices = @transform_4, window_bounds = array<i64: 1, 3, 16, 128>}, {transform_indices = @transform_5, window_bounds = array<i64: 1, 1, 16, 128>}, {transform_indices = @transform_6, window_bounds = array<i64: 1, 8, 128>}]} {
    %c0 = arith.constant 0 : index
    %c0_0 = arith.constant 0 : index
    %c0_1 = arith.constant 0 : index
    %c0_2 = arith.constant 0 : index
    %0 = vector.load %arg1[%c0, %c0_0, %c0_1, %c0_2] : memref<1x3x16x128xf32, #tpu.memory_space<vmem>>, vector<1x3x16x128xf32>
    %1 = vector.shape_cast %0 : vector<1x3x16x128xf32> to vector<3x16x128xf32>
    %c0_3 = arith.constant 0 : index
    %c0_4 = arith.constant 0 : index
    %c0_5 = arith.constant 0 : index
    %c0_6 = arith.constant 0 : index
    %2 = vector.load %arg2[%c0_3, %c0_4, %c0_5, %c0_6] : memref<1x3x16x128xf32, #tpu.memory_space<vmem>>, vector<1x3x16x128xf32>
    %3 = vector.shape_cast %2 : vector<1x3x16x128xf32> to vector<3x16x128xf32>
    %c0_7 = arith.constant 0 : index
    %c0_8 = arith.constant 0 : index
    %c0_9 = arith.constant 0 : index
    %c0_10 = arith.constant 0 : index
    %4 = vector.load %arg3[%c0_7, %c0_8, %c0_9, %c0_10] : memref<1x3x16x128xf32, #tpu.memory_space<vmem>>, vector<1x3x16x128xf32>
    %5 = vector.shape_cast %4 : vector<1x3x16x128xf32> to vector<3x16x128xf32>
    %c0_11 = arith.constant 0 : index
    %c0_12 = arith.constant 0 : index
    %c0_13 = arith.constant 0 : index
    %c0_14 = arith.constant 0 : index
    %6 = vector.load %arg5[%c0_11, %c0_12, %c0_13, %c0_14] : memref<1x3x16x128xf32, #tpu.memory_space<vmem>>, vector<1x3x16x128xf32>
    %7 = vector.shape_cast %6 : vector<1x3x16x128xf32> to vector<3x16x128xf32>
    %c0_15 = arith.constant 0 : index
    %c0_16 = arith.constant 0 : index
    %c0_17 = arith.constant 0 : index
    %c0_18 = arith.constant 0 : index
    %8 = vector.load %arg4[%c0_15, %c0_16, %c0_17, %c0_18] : memref<1x1x16x128xf32, #tpu.memory_space<vmem>>, vector<1x1x16x128xf32>
    %9 = vector.shape_cast %8 : vector<1x1x16x128xf32> to vector<16x128xf32>
    %c0_19 = arith.constant 0 : index
    %c0_20 = arith.constant 0 : index
    %c0_21 = arith.constant 0 : index
    %c0_22 = arith.constant 0 : index
    %10 = vector.load %arg6[%c0_19, %c0_20, %c0_21, %c0_22] : memref<1x1x16x128xf32, #tpu.memory_space<vmem>>, vector<1x1x16x128xf32>
    %11 = vector.shape_cast %10 : vector<1x1x16x128xf32> to vector<16x128xf32>
    %12 = tpu.iota {dimensions = array<i32: 1>} : vector<16x128xi32>
    %13 = tpu.iota {dimensions = array<i32: 0>} : vector<16x128xi32>
    %c127_i32 = arith.constant 127 : i32
    %14 = tpu.dynamic_rotate %12 by %c127_i32 dim 1 : vector<16x128xi32>, i32 -> vector<16x128xi32>
    %15 = arith.subi %14, %12 : vector<16x128xi32>
    %16 = math.absi %15 : vector<16x128xi32>
    %c1_i32 = arith.constant 1 : i32
    %17 = vector.broadcast %c1_i32 : i32 to vector<16x128xi32>
    %18 = arith.cmpi eq, %16, %17 : vector<16x128xi32>
    %19 = arith.extui %18 : vector<16x128xi1> to vector<16x128xi32>
    %20 = arith.sitofp %19 : vector<16x128xi32> to vector<16x128xf32>
    %c15_i32 = arith.constant 15 : i32
    %21 = tpu.dynamic_rotate %13 by %c15_i32 dim 0 : vector<16x128xi32>, i32 -> vector<16x128xi32>
    %22 = arith.subi %21, %13 : vector<16x128xi32>
    %23 = math.absi %22 : vector<16x128xi32>
    %c1_i32_23 = arith.constant 1 : i32
    %24 = vector.broadcast %c1_i32_23 : i32 to vector<16x128xi32>
    %25 = arith.cmpi eq, %23, %24 : vector<16x128xi32>
    %26 = arith.extui %25 : vector<16x128xi1> to vector<16x128xi32>
    %27 = arith.sitofp %26 : vector<16x128xi32> to vector<16x128xf32>
    %28 = vector.shape_cast %9 : vector<16x128xf32> to vector<1x16x128xf32>
    %29 = vector.broadcast %28 : vector<1x16x128xf32> to vector<3x16x128xf32>
    %30 = arith.mulf %5, %29 : vector<3x16x128xf32>
    %31 = arith.subf %30, %1 : vector<3x16x128xf32>
    %32 = math.absf %31 : vector<3x16x128xf32>
    %33 = vector.shape_cast %11 : vector<16x128xf32> to vector<1x16x128xf32>
    %34 = vector.broadcast %33 : vector<1x16x128xf32> to vector<3x16x128xf32>
    %35 = arith.mulf %7, %34 : vector<3x16x128xf32>
    %36 = arith.subf %35, %3 : vector<3x16x128xf32>
    %37 = math.absf %36 : vector<3x16x128xf32>
    %38 = arith.addf %32, %37 : vector<3x16x128xf32>
    %cst = arith.constant 8.13802107E-5 : f32
    %39 = vector.broadcast %cst : f32 to vector<3x16x128xf32>
    %40 = arith.mulf %38, %39 : vector<3x16x128xf32>
    %41 = arith.subf %5, %7 : vector<3x16x128xf32>
    %42 = math.absf %41 : vector<3x16x128xf32>
    %cst_24 = arith.constant 8.13802103E-7 : f32
    %43 = vector.broadcast %cst_24 : f32 to vector<3x16x128xf32>
    %44 = arith.mulf %42, %43 : vector<3x16x128xf32>
    %45 = arith.addf %40, %44 : vector<3x16x128xf32>
    %c127_i32_25 = arith.constant 127 : i32
    %46 = tpu.dynamic_rotate %9 by %c127_i32_25 dim 1 : vector<16x128xf32>, i32 -> vector<16x128xf32>
    %47 = arith.subf %46, %9 : vector<16x128xf32>
    %48 = math.absf %47 : vector<16x128xf32>
    %49 = arith.mulf %20, %48 : vector<16x128xf32>
    %c15_i32_26 = arith.constant 15 : i32
    %50 = tpu.dynamic_rotate %9 by %c15_i32_26 dim 0 : vector<16x128xf32>, i32 -> vector<16x128xf32>
    %51 = arith.subf %50, %9 : vector<16x128xf32>
    %52 = math.absf %51 : vector<16x128xf32>
    %53 = arith.mulf %27, %52 : vector<16x128xf32>
    %c127_i32_27 = arith.constant 127 : i32
    %54 = tpu.dynamic_rotate %11 by %c127_i32_27 dim 1 : vector<16x128xf32>, i32 -> vector<16x128xf32>
    %55 = arith.subf %54, %11 : vector<16x128xf32>
    %56 = math.absf %55 : vector<16x128xf32>
    %57 = arith.mulf %20, %56 : vector<16x128xf32>
    %c15_i32_28 = arith.constant 15 : i32
    %58 = tpu.dynamic_rotate %11 by %c15_i32_28 dim 0 : vector<16x128xf32>, i32 -> vector<16x128xf32>
    %59 = arith.subf %58, %11 : vector<16x128xf32>
    %60 = math.absf %59 : vector<16x128xf32>
    %61 = arith.mulf %27, %60 : vector<16x128xf32>
    %62 = arith.addf %49, %57 : vector<16x128xf32>
    %63 = arith.addf %53, %61 : vector<16x128xf32>
    %cst_29 = arith.constant -1.000000e+01 : f32
    %64 = vector.broadcast %cst_29 : f32 to vector<16x128xf32>
    %65 = arith.mulf %64, %62 : vector<16x128xf32>
    %66 = math.exp %65 : vector<16x128xf32>
    %67 = arith.mulf %62, %66 : vector<16x128xf32>
    %cst_30 = arith.constant -1.000000e+01 : f32
    %68 = vector.broadcast %cst_30 : f32 to vector<16x128xf32>
    %69 = arith.mulf %68, %63 : vector<16x128xf32>
    %70 = math.exp %69 : vector<16x128xf32>
    %71 = arith.mulf %63, %70 : vector<16x128xf32>
    %72 = arith.addf %67, %71 : vector<16x128xf32>
    %cst_31 = arith.constant dense<0.000000e+00> : vector<16x128xf32>
    %73 = vector.multi_reduction <add>, %1, %cst_31 [0] : vector<3x16x128xf32> to vector<16x128xf32>
    %cst_32 = arith.constant 3.000000e+00 : f32
    %74 = vector.broadcast %cst_32 : f32 to vector<16x128xf32>
    %75 = arith.divf %73, %74 : vector<16x128xf32>
    %cst_33 = arith.constant dense<0.000000e+00> : vector<16x128xf32>
    %76 = vector.multi_reduction <add>, %3, %cst_33 [0] : vector<3x16x128xf32> to vector<16x128xf32>
    %cst_34 = arith.constant 3.000000e+00 : f32
    %77 = vector.broadcast %cst_34 : f32 to vector<16x128xf32>
    %78 = arith.divf %76, %77 : vector<16x128xf32>
    %c127_i32_35 = arith.constant 127 : i32
    %79 = tpu.dynamic_rotate %78 by %c127_i32_35 dim 1 : vector<16x128xf32>, i32 -> vector<16x128xf32>
    %80 = arith.subf %79, %78 : vector<16x128xf32>
    %81 = math.absf %80 : vector<16x128xf32>
    %82 = arith.mulf %20, %81 : vector<16x128xf32>
    %cst_36 = arith.constant 0.00999999977 : f32
    %83 = vector.broadcast %cst_36 : f32 to vector<16x128xf32>
    %84 = arith.maximumf %82, %83 : vector<16x128xf32>
    %85 = tpu.reciprocal %84 {approx = true} : vector<16x128xf32> -> vector<16x128xf32>
    %86 = arith.mulf %57, %85 : vector<16x128xf32>
    %c15_i32_37 = arith.constant 15 : i32
    %87 = tpu.dynamic_rotate %78 by %c15_i32_37 dim 0 : vector<16x128xf32>, i32 -> vector<16x128xf32>
    %88 = arith.subf %87, %78 : vector<16x128xf32>
    %89 = math.absf %88 : vector<16x128xf32>
    %90 = arith.mulf %27, %89 : vector<16x128xf32>
    %cst_38 = arith.constant 0.00999999977 : f32
    %91 = vector.broadcast %cst_38 : f32 to vector<16x128xf32>
    %92 = arith.maximumf %90, %91 : vector<16x128xf32>
    %93 = tpu.reciprocal %92 {approx = true} : vector<16x128xf32> -> vector<16x128xf32>
    %94 = arith.mulf %61, %93 : vector<16x128xf32>
    %95 = arith.addf %86, %94 : vector<16x128xf32>
    %c127_i32_39 = arith.constant 127 : i32
    %96 = tpu.dynamic_rotate %75 by %c127_i32_39 dim 1 : vector<16x128xf32>, i32 -> vector<16x128xf32>
    %97 = arith.subf %96, %75 : vector<16x128xf32>
    %98 = math.absf %97 : vector<16x128xf32>
    %99 = arith.mulf %20, %98 : vector<16x128xf32>
    %cst_40 = arith.constant 0.00999999977 : f32
    %100 = vector.broadcast %cst_40 : f32 to vector<16x128xf32>
    %101 = arith.maximumf %99, %100 : vector<16x128xf32>
    %102 = tpu.reciprocal %101 {approx = true} : vector<16x128xf32> -> vector<16x128xf32>
    %103 = arith.mulf %49, %102 : vector<16x128xf32>
    %c15_i32_41 = arith.constant 15 : i32
    %104 = tpu.dynamic_rotate %75 by %c15_i32_41 dim 0 : vector<16x128xf32>, i32 -> vector<16x128xf32>
    %105 = arith.subf %104, %75 : vector<16x128xf32>
    %106 = math.absf %105 : vector<16x128xf32>
    %107 = arith.mulf %27, %106 : vector<16x128xf32>
    %cst_42 = arith.constant 0.00999999977 : f32
    %108 = vector.broadcast %cst_42 : f32 to vector<16x128xf32>
    %109 = arith.maximumf %107, %108 : vector<16x128xf32>
    %110 = tpu.reciprocal %109 {approx = true} : vector<16x128xf32> -> vector<16x128xf32>
    %111 = arith.mulf %53, %110 : vector<16x128xf32>
    %112 = arith.addf %103, %111 : vector<16x128xf32>
    %cst_43 = arith.constant 4.88281257E-5 : f32
    %113 = vector.broadcast %cst_43 : f32 to vector<16x128xf32>
    %114 = arith.mulf %72, %113 : vector<16x128xf32>
    %cst_44 = arith.constant 4.88281239E-6 : f32
    %115 = vector.broadcast %cst_44 : f32 to vector<16x128xf32>
    %116 = arith.mulf %95, %115 : vector<16x128xf32>
    %117 = arith.addf %114, %116 : vector<16x128xf32>
    %cst_45 = arith.constant 3.66210952E-5 : f32
    %118 = vector.broadcast %cst_45 : f32 to vector<16x128xf32>
    %119 = arith.mulf %112, %118 : vector<16x128xf32>
    %120 = arith.addf %117, %119 : vector<16x128xf32>
    %121 = vector.shape_cast %45 : vector<3x16x128xf32> to vector<1x3x16x128xf32>
    %cst_46 = arith.constant dense<0.000000e+00> : vector<1xf32>
    %122 = vector.multi_reduction <add>, %121, %cst_46 [1, 2, 3] : vector<1x3x16x128xf32> to vector<1xf32>
    %123 = vector.shape_cast %122 : vector<1xf32> to vector<1x1x1x1xf32>
    %124 = vector.extract %123[0, 0, 0, 0] : f32 from vector<1x1x1x1xf32>
    %125 = vector.shape_cast %120 : vector<16x128xf32> to vector<1x16x128xf32>
    %cst_47 = arith.constant dense<0.000000e+00> : vector<1xf32>
    %126 = vector.multi_reduction <add>, %125, %cst_47 [1, 2] : vector<1x16x128xf32> to vector<1xf32>
    %127 = vector.shape_cast %126 : vector<1xf32> to vector<1x1x1xf32>
    %128 = vector.extract %127[0, 0, 0] : f32 from vector<1x1x1xf32>
    %129 = arith.addf %124, %128 : f32
    %130 = vector.broadcast %129 : f32 to vector<1x8x128xf32>
    %c0_48 = arith.constant 0 : index
    %c0_49 = arith.constant 0 : index
    %c0_50 = arith.constant 0 : index
    %131 = vector.load %arg7[%c0_48, %c0_49, %c0_50] : memref<1x8x128xf32, #tpu.memory_space<vmem>>, vector<1x8x128xf32>
    tpu.vector_store %arg7[%c0_48, %c0_49, %c0_50], %130 {strides = array<i32>} : memref<1x8x128xf32, #tpu.memory_space<vmem>>, vector<1x8x128xf32>,
    return
  }
  func.func @transform_0(%arg0: i32) -> (i32, i32, i32, i32) {
    %c0_i32 = arith.constant 0 : i32
    %c0_i32_0 = arith.constant 0 : i32
    %c0_i32_1 = arith.constant 0 : i32
    %c0_i32_2 = arith.constant 0 : i32
    return %arg0, %c0_i32, %c0_i32_0, %c0_i32_1 : i32, i32, i32, i32
  }
  func.func @transform_1(%arg0: i32) -> (i32, i32, i32, i32) {
    %c0_i32 = arith.constant 0 : i32
    %c0_i32_0 = arith.constant 0 : i32
    %c0_i32_1 = arith.constant 0 : i32
    %c0_i32_2 = arith.constant 0 : i32
    return %arg0, %c0_i32, %c0_i32_0, %c0_i32_1 : i32, i32, i32, i32
  }
  func.func @transform_2(%arg0: i32) -> (i32, i32, i32, i32) {
    %c0_i32 = arith.constant 0 : i32
    %c0_i32_0 = arith.constant 0 : i32
    %c0_i32_1 = arith.constant 0 : i32
    %c0_i32_2 = arith.constant 0 : i32
    return %arg0, %c0_i32, %c0_i32_0, %c0_i32_1 : i32, i32, i32, i32
  }
  func.func @transform_3(%arg0: i32) -> (i32, i32, i32, i32) {
    %c0_i32 = arith.constant 0 : i32
    %c0_i32_0 = arith.constant 0 : i32
    %c0_i32_1 = arith.constant 0 : i32
    %c0_i32_2 = arith.constant 0 : i32
    return %arg0, %c0_i32, %c0_i32_0, %c0_i32_1 : i32, i32, i32, i32
  }
  func.func @transform_4(%arg0: i32) -> (i32, i32, i32, i32) {
    %c0_i32 = arith.constant 0 : i32
    %c0_i32_0 = arith.constant 0 : i32
    %c0_i32_1 = arith.constant 0 : i32
    %c0_i32_2 = arith.constant 0 : i32
    return %arg0, %c0_i32, %c0_i32_0, %c0_i32_1 : i32, i32, i32, i32
  }
  func.func @transform_5(%arg0: i32) -> (i32, i32, i32, i32) {
    %c0_i32 = arith.constant 0 : i32
    %c0_i32_0 = arith.constant 0 : i32
    %c0_i32_1 = arith.constant 0 : i32
    %c0_i32_2 = arith.constant 0 : i32
    return %arg0, %c0_i32, %c0_i32_0, %c0_i32_1 : i32, i32, i32, i32
  }
  func.func @transform_6(%arg0: i32) -> (i32, i32, i32) {
    %c0_i32 = arith.constant 0 : i32
    %c0_i32_0 = arith.constant 0 : i32
    %c0_i32_1 = arith.constant 0 : i32
    return %arg0, %c0_i32, %c0_i32_0 : i32, i32, i32
  }
}

</mosaic_0001>

<bundles_post_ra>
// kernel: tpu_custom_call.1
= control target key start
LH: loop header
LB: loop body
LE: loop exit
PB: predicated region body
PF: predicated region fallthrough
CT: control target
= control target key end

     0   :  { %s1977_s0 = inlined_call_operand.hbm [shape: f32[2,3,16,128], index: 0, kind: input, shape index: {}]   ;;  %s1978_s1 = inlined_call_operand.hbm [shape: f32[2,3,16,128], index: 1, kind: input, shape index: {}]   ;;  %s1979_s2 = inlined_call_operand.hbm [shape: f32[2,3,16,128], index: 2, kind: input, shape index: {}]   ;;  %s1980_s3 = inlined_call_operand.hbm [shape: f32[2,1,16,128], index: 3, kind: input, shape index: {}]   ;;  %s1981_s4 = inlined_call_operand.hbm [shape: f32[2,3,16,128], index: 4, kind: input, shape index: {}]   ;;  %s1982_s5 = inlined_call_operand.hbm [shape: f32[2,1,16,128], index: 5, kind: input, shape index: {}]   ;;  %s1983_s6 = inlined_call_operand.hbm [shape: f32[2,8,128], index: 6, kind: output, shape index: {}]  }
   0x1   :  { %2001 = sst [smem:[#allocation25_spill]] %s1977_s0 }
   0x2   :  { %2002 = sst [smem:[#allocation26_spill]] %s1978_s1 }
   0x3   :  { %2003 = sst [smem:[#allocation27_spill]] %s1980_s3 }
   0x4   :  { %2004 = sst [smem:[#allocation28_spill]] %s1983_s6 }
   0x5   :  { %11 = vsyncpa [#allocation3], 0 }
   0x6   :  { %13 = vsyncpa [#allocation3 + $0x1], 0 }
   0x7   :  { %14 = vsyncpa [#allocation6], 0 }
   0x8   :  { %16 = vsyncpa [#allocation6 + $0x1], 0 }
   0x9   :  { %17 = vsyncpa [#allocation9], 0 }
   0xa   :  { %19 = vsyncpa [#allocation9 + $0x1], 0 }
   0xb   :  { %20 = vsyncpa [#allocation12], 0 }
   0xc   :  { %22 = vsyncpa [#allocation12 + $0x1], 0 }
   0xd   :  { %23 = vsyncpa [#allocation4], 0 }
   0xe   :  { %25 = vsyncpa [#allocation4 + $0x1], 0  ;;  %s1417_s21 = smov 0   ;;  %s1419_s22 = smov 0  }
   0xf   :  { %s1421_s23 = smov 0   ;;  %s1423_s24 = smov 0  }
  0x10 LB: > { %2005 = sst [smem:[#allocation19_spill]] %s1357_s21  ;;  %s1438_s25 = sadd.s32 4294967295, %s1369_s24   ;;  %s1369_s24 = sphi %s1423_s24, %s2035_s24   ;;  %s1365_s23 = sphi %s1421_s23, %s2037_s23   ;;  %s1361_s22 = sphi %s1419_s22, %s2039_s22   ;;  %s1357_s21 = sphi %s1417_s21, %s2038_s21  }
  0x11   : > { %2006 = sst [smem:[#allocation20_spill]] %s1365_s23  ;;  %s970_s26 = sadd.s32 4294967294, %s1369_s24  }
  0x12   : > { %s1442_s27 = sadd.s32 1, %s1369_s24   ;;  %s38_s28 = sadd.s32 1, %s1365_s23 }
  0x13   : > { %2007 = sst [smem:[#allocation21_spill]] %s1442_s27  ;;  %s35_s29 = ssub.s32 %s1369_s24, %s1442_s27 }
  0x14   : > { %p45_p0 = scmp.ne.s32.totalorder %s1365_s23, %s1361_s22  ;;  %p36_p1 = scmp.eq.s32.totalorder %s35_s29, 0 }
  0x15   : > { %p46_p2 = scmp.eq.s32.totalorder %s1369_s24, 0  ;;  %p51_p3 = scmp.ne.s32.totalorder %s1361_s22, %s1357_s21 }
  0x16   : > { %p52_p4 = scmp.eq.s32.totalorder %s1438_s25, 0  ;;  %p205_p7 = scmp.eq.s32.totalorder %s1438_s25, 1 }
  0x17   : > { %s1454_s30 = scalar_select %p36_p1, %s1365_s23, %s38_s28  }
  0x18   : > { %p47_p5 = por %p46_p2, %p45_p0  ;;  %p1456_p6 = por %p52_p4, %p51_p3 }
  0x19   : > { %2008 = sst [smem:[#allocation22_spill]] %s1454_s30  ;;  %p211_p8 = scmp.eq.s32.totalorder %s970_s26, 1 }
  0x1a   : > { %s2009_s7 = scalar_select %p1456_p6, 1, 0 }
  0x1b   : > { %p1049_p10 = scmp.lt.s32.totalorder %s1369_s24, 2  ;;  %p1463_p11 = por %p205_p7, %p45_p0 }
  0x1c   : > { %p1467_p12 = por %p211_p8, %p51_p3  ;;  %s1472_s10 = sand.u32 1, %s1365_s23  }
  0x1d   : > { %s2010_s8 = scalar_select %p1463_p11, 1, 0 }
  0x1e   : > { %s2012_s9 = scalar_select %p1467_p12, 1, 0 }
  0x1f   : > { %2011 = sst [smem:[#allocation23_spill]] %s2010_s8  ;;  %s1475_s11 = smul.u32 768, %s1369_s24 }
  0x20   : > { %2013 = sst [smem:[#allocation24_spill]] %s2012_s9  ;;  %s1478_s12 = smul.u32 48, %s1472_s10 }
  0x21   : > { %p1480_p13 = pnand %p1049_p10, %p47_p5  ;;  %s1984_s14 = sand.u32 1, %s1369_s24  }
  0x22   : > { %s2015_s1 = sld [smem:[#allocation26_spill]]  ;;  %s256_s18 = scalar_lea.vmem [#allocation5], %s1478_s12 }
  0x23   : > { %s263_s19 = sshll.u32 %s256_s18, 4  ;;  %s1497_s20 = scalar_lea.sflag [#allocation6], %s1984_s14  ;;  %s1492_s19 = int_to_ptr.vmem [resolvable:$true] %s263_s19 }
  0x24   : > { %p1503_p2 = pneg %p1480_p13 }
  0x28   : > { %s1489_s17 = scalar_lea.hbm %s2015_s1, %s1475_s11  ;;  %s1116_s16 = scalar_lea.hbm %s2015_s1, 1536 }
  0x29   : > { %s1111_s26 = scalar_lea.hbm %s1489_s17, 768  ;;  %p1117_p5 = scmp.lt.u32.totalorder %s1489_s17, %s2015_s1 }
  0x2a   : > { %p1112_p1 = scmp.ne.s32.totalorder %s1489_s17, %s1111_s26  ;;  %p1118_p7 = scmp.lt.u32.totalorder %s1116_s16, %s1111_s26 }
  0x2b   : > { %p1120_p10 = scmp.lt.u32.totalorder %s1111_s26, %s1489_s17 }
  0x2c   : > { %p1114_p3 = pnand %p1503_p2, %p1112_p1  ;;  %p1119_p8 = por %p1118_p7, %p1117_p5 }
  0x2e   : > { %p1115_p4 = pneg %p1114_p3  ;;  %p1121_p9 = por %p1120_p10, %p1119_p8 }
  0x30   : > { %p1122_p0 = pnand %p1121_p9, %p1115_p4 }
  0x32   : > { %1125 = shalt.err (!%p1122_p0)
}
  0x33   : > { %s1126_s14 = scalar_lea.vmem %s1492_s19, 768  ;;  %s1371_s29 = smov [#allocation5]  }
  0x34   : > { %p1127_p1 = scmp.ne.s32.totalorder %s1492_s19, %s1126_s14  ;;  %s1131_s15 = sshll.u32 %s1371_s29, 4  ;;  %s1132_s15 = int_to_ptr.vmem [resolvable:$false] %s1131_s15 }
  0x35   : > { %s1133_s30 = scalar_lea.vmem %s1132_s15, 1536  ;;  %p1134_p11 = scmp.lt.s32.totalorder %s1492_s19, %s1132_s15 }
  0x36   : > { %p1129_p3 = pnand %p1127_p1, %p1503_p2  ;;  %p1135_p6 = scmp.lt.s32.totalorder %s1133_s30, %s1126_s14 }
  0x38   : > { %p1130_p12 = pneg %p1129_p3  ;;  %p1136_p5 = por %p1135_p6, %p1134_p11 }
  0x3a   : > { %p1137_p7 = pnand %p1136_p5, %p1130_p12 }
  0x3c   : > { %1140 = shalt.err (!%p1137_p7)
}
  0x3d   : > { %s1987_s26 = smov 128   ;;  %s1989_s16 = smov 8  }
  0x3e   : > { %1032 = dma.hbm_to_vmem [thread:$0]  (!%p1480_p13), %s1489_s17, 768, %s1492_s19, %s1497_s20, %s1987_s26, %s1987_s26, %s1989_s16  }
  0x3f   : > { %p355_p6 = scmp.lt.s32.totalorder %s1369_s24, 3  ;;  %s1996_s14 = sshll.u32 %s1472_s10, 4 }
  0x40   : > { %s1992_s18 = sshll.u32 %s1369_s24, 8  ;;  %p2017_p9 = scmp.ge.s32.totalorder %s1369_s24, 1 }
  0x41   : > { %s2019_s3 = sld [smem:[#allocation27_spill]]  ;;  %s298_s17 = scalar_lea.vmem [#allocation8], %s1996_s14 }
  0x42   : > { %p1535_p11 = pnand %p2017_p9, %p355_p6  ;;  %s305_s19 = sshll.u32 %s298_s17, 4  ;;  %s1548_s19 = int_to_ptr.vmem [resolvable:$true] %s305_s19 }
  0x43   : > { %s2020_s26 = sand.u32 1, %s1369_s24  }
  0x44   : > { %s2018_s29 = scalar_select %p1535_p11, 1, 0 }
  0x45   : > { %s1552_s16 = scalar_lea.sflag [#allocation9], %s2020_s26 }
  0x47   : > { %s1544_s1 = scalar_lea.hbm %s2019_s3, %s1992_s18  ;;  %s1146_s18 = scalar_lea.hbm %s2019_s3, 512 }
  0x48   : > { %s1141_s23 = scalar_lea.hbm %s1544_s1, 256  ;;  %p1147_p8 = scmp.lt.u32.totalorder %s1544_s1, %s2019_s3 }
  0x49   : > { %p1142_p12 = scmp.ne.s32.totalorder %s1544_s1, %s1141_s23  ;;  %p1148_p10 = scmp.lt.u32.totalorder %s1146_s18, %s1141_s23 }
  0x4a   : > { %p1150_p3 = scmp.lt.u32.totalorder %s1141_s23, %s1544_s1 }
  0x4b   : > { %p1144_p0 = pnand %p1142_p12, %p1503_p2  ;;  %p1149_p1 = por %p1148_p10, %p1147_p8 }
  0x4d   : > { %p1145_p4 = pneg %p1144_p0  ;;  %p1151_p5 = por %p1150_p3, %p1149_p1 }
  0x4f   : > { %p1152_p7 = pnand %p1151_p5, %p1145_p4 }
  0x51   : > { %1155 = shalt.err (!%p1152_p7)
}
  0x52   : > { %s1156_s26 = scalar_lea.vmem %s1548_s19, 256  ;;  %s1374_s17 = smov [#allocation8]  }
  0x53   : > { %p1157_p6 = scmp.ne.s32.totalorder %s1548_s19, %s1156_s26  ;;  %s1161_s15 = sshll.u32 %s1374_s17, 4  ;;  %s1162_s15 = int_to_ptr.vmem [resolvable:$false] %s1161_s15 }
  0x54   : > { %s1163_s27 = scalar_lea.vmem %s1162_s15, 512  ;;  %p1164_p0 = scmp.lt.s32.totalorder %s1548_s19, %s1162_s15 }
  0x55   : > { %p1159_p9 = pnand %p1157_p6, %p1503_p2  ;;  %p1165_p11 = scmp.lt.s32.totalorder %s1163_s27, %s1156_s26 }
  0x57   : > { %p1160_p12 = pneg %p1159_p9  ;;  %p1166_p8 = por %p1165_p11, %p1164_p0 }
  0x59   : > { %p1167_p10 = pnand %p1166_p8, %p1160_p12 }
  0x5b   : > { %1170 = shalt.err (!%p1167_p10)
}
  0x5c   : > { %s2021_s23 = smov 8   ;;  %s2022_s9 = smov 128  }
  0x5d   : > { %1038 = dma.hbm_to_vmem [thread:$0]  (!%p1480_p13), %s1544_s1, 256, %s1548_s19, %s1552_s16, %s2022_s9, %s2022_s9, %s2021_s23  }
  0x5e   : > { %s2023_s0 = sld [smem:[#allocation25_spill]]  ;;  %s235_s17 = scalar_lea.vmem [#allocation2], %s1478_s12 }
  0x5f   : > { %s242_s15 = sshll.u32 %s235_s17, 4  ;;  %s1592_s3 = scalar_lea.hbm %s1979_s2, %s1475_s11  ;;  %s1586_s15 = int_to_ptr.vmem [resolvable:$true] %s242_s15 }
  0x60   : > { %s232_s21 = scalar_lea.sflag [#allocation3], %s1472_s10 }
  0x64   : > { %s1583_s26 = scalar_lea.hbm %s2023_s0, %s1475_s11  ;;  %s1176_s30 = scalar_lea.hbm %s2023_s0, 1536 }
  0x65   : > { %s1171_s1 = scalar_lea.hbm %s1583_s26, 768  ;;  %p1177_p3 = scmp.lt.u32.totalorder %s1583_s26, %s2023_s0 }
  0x66   : > { %p1172_p11 = scmp.ne.s32.totalorder %s1583_s26, %s1171_s1  ;;  %p1178_p5 = scmp.lt.u32.totalorder %s1176_s30, %s1171_s1 }
  0x67   : > { %p1180_p6 = scmp.lt.u32.totalorder %s1171_s1, %s1583_s26 }
  0x68   : > { %p1174_p4 = pnand %p1172_p11, %p1503_p2  ;;  %p1179_p7 = por %p1178_p5, %p1177_p3 }
  0x6a   : > { %p1175_p1 = pneg %p1174_p4  ;;  %p1181_p9 = por %p1180_p6, %p1179_p7 }
  0x6c   : > { %p1182_p12 = pnand %p1181_p9, %p1175_p1 }
  0x6e   : > { %1185 = shalt.err (!%p1182_p12)
}
  0x6f   : > { %s1186_s14 = scalar_lea.vmem %s1586_s15, 768  ;;  %s1375_s17 = smov [#allocation2]  }
  0x70   : > { %p1187_p0 = scmp.ne.s32.totalorder %s1586_s15, %s1186_s14  ;;  %s1191_s27 = sshll.u32 %s1375_s17, 4  ;;  %s1192_s27 = int_to_ptr.vmem [resolvable:$false] %s1191_s27 }
  0x71   : > { %s1193_s6 = scalar_lea.vmem %s1192_s27, 1536  ;;  %p1194_p11 = scmp.lt.s32.totalorder %s1586_s15, %s1192_s27 }
  0x72   : > { %p1189_p8 = pnand %p1187_p0, %p1503_p2  ;;  %p1195_p4 = scmp.lt.s32.totalorder %s1193_s6, %s1186_s14 }
  0x74   : > { %p1190_p10 = pneg %p1189_p8  ;;  %p1196_p3 = por %p1195_p4, %p1194_p11 }
  0x76   : > { %p1197_p5 = pnand %p1196_p3, %p1190_p10 }
  0x78   : > { %1200 = shalt.err (!%p1197_p5)
}
  0x79   : > { %1029 = dma.hbm_to_vmem [thread:$0]  (!%p1480_p13), %s1583_s26, 768, %s1586_s15, %s232_s21, %s2022_s9, %s2022_s9, %s2021_s23  }
  0x7a   : > { %s277_s8 = scalar_lea.vmem [#allocation7], %s1478_s12  ;;  %s1628_s30 = scalar_lea.hbm %s1981_s4, %s1475_s11 }
  0x7b   : > { %s284_s1 = sshll.u32 %s277_s8, 4  ;;  %s1201_s14 = scalar_lea.hbm %s1592_s3, 768  ;;  %s1622_s1 = int_to_ptr.vmem [resolvable:$true] %s284_s1 }
  0x7c   : > { %p1202_p1 = scmp.ne.s32.totalorder %s1592_s3, %s1201_s14  ;;  %s1206_s6 = scalar_lea.hbm %s1979_s2, 1536 }
  0x7d   : > { %p1207_p9 = scmp.lt.u32.totalorder %s1592_s3, %s1979_s2  ;;  %p1208_p12 = scmp.lt.u32.totalorder %s1206_s6, %s1201_s14 }
  0x7e   : > { %p1204_p7 = pnand %p1202_p1, %p1503_p2  ;;  %p1210_p8 = scmp.lt.u32.totalorder %s1201_s14, %s1592_s3 }
  0x7f   : > { %p1209_p0 = por %p1208_p12, %p1207_p9 }
  0x80   : > { %p1205_p6 = pneg %p1204_p7 }
  0x81   : > { %p1211_p10 = por %p1210_p8, %p1209_p0 }
  0x83   : > { %p1212_p11 = pnand %p1211_p10, %p1205_p6 }
  0x85   : > { %1215 = shalt.err (!%p1212_p11)
}
  0x86   : > { %s1216_s11 = scalar_lea.vmem %s1622_s1, 768  ;;  %s1376_s26 = smov [#allocation7]  }
  0x87   : > { %p1217_p4 = scmp.ne.s32.totalorder %s1622_s1, %s1216_s11  ;;  %s1221_s15 = sshll.u32 %s1376_s26, 4  ;;  %s1222_s15 = int_to_ptr.vmem [resolvable:$false] %s1221_s15 }
  0x88   : > { %s1223_s0 = scalar_lea.vmem %s1222_s15, 1536  ;;  %p1224_p1 = scmp.lt.s32.totalorder %s1622_s1, %s1222_s15 }
  0x89   : > { %p1219_p3 = pnand %p1217_p4, %p1503_p2  ;;  %p1225_p7 = scmp.lt.s32.totalorder %s1223_s0, %s1216_s11 }
  0x8b   : > { %p1220_p5 = pneg %p1219_p3  ;;  %p1226_p9 = por %p1225_p7, %p1224_p1 }
  0x8d   : > { %p1227_p12 = pnand %p1226_p9, %p1220_p5 }
  0x8f   : > { %1230 = shalt.err (!%p1227_p12)
}
  0x90   : > { %1035 = dma.hbm_to_vmem [thread:$0]  (!%p1480_p13), %s1592_s3, 768, %s1622_s1, %s1497_s20, %s2022_s9, %s2022_s9, %s2021_s23  }
  0x91   : > { %s319_s8 = scalar_lea.vmem [#allocation10], %s1478_s12  ;;  %s1231_s18 = scalar_lea.hbm %s1628_s30, 768 }
  0x92   : > { %s326_s19 = sshll.u32 %s319_s8, 4  ;;  %p1232_p6 = scmp.ne.s32.totalorder %s1628_s30, %s1231_s18  ;;  %s1656_s19 = int_to_ptr.vmem [resolvable:$true] %s326_s19 }
  0x93   : > { %s1236_s27 = scalar_lea.hbm %s1981_s4, 1536  ;;  %p1237_p10 = scmp.lt.u32.totalorder %s1628_s30, %s1981_s4 }
  0x94   : > { %p1234_p0 = pnand %p1232_p6, %p1503_p2  ;;  %p1238_p11 = scmp.lt.u32.totalorder %s1236_s27, %s1231_s18 }
  0x95   : > { %p1240_p3 = scmp.lt.u32.totalorder %s1231_s18, %s1628_s30 }
  0x96   : > { %p1235_p8 = pneg %p1234_p0  ;;  %p1239_p4 = por %p1238_p11, %p1237_p10 }
  0x98   : > { %p1241_p5 = por %p1240_p3, %p1239_p4 }
  0x9a   : > { %p1242_p1 = pnand %p1241_p5, %p1235_p8 }
  0x9c   : > { %1245 = shalt.err (!%p1242_p1)
}
  0x9d   : > { %s1246_s3 = scalar_lea.vmem %s1656_s19, 768  ;;  %s1377_s12 = smov [#allocation10]  }
  0x9e   : > { %p1247_p7 = scmp.ne.s32.totalorder %s1656_s19, %s1246_s3  ;;  %s1251_s20 = sshll.u32 %s1377_s12, 4  ;;  %s1252_s20 = int_to_ptr.vmem [resolvable:$false] %s1251_s20 }
  0x9f   : > { %s1253_s1 = scalar_lea.vmem %s1252_s20, 1536  ;;  %p1254_p6 = scmp.lt.s32.totalorder %s1656_s19, %s1252_s20 }
  0xa0   : > { %p1249_p9 = pnand %p1247_p7, %p1503_p2  ;;  %p1255_p0 = scmp.lt.s32.totalorder %s1253_s1, %s1246_s3 }
  0xa2   : > { %p1250_p12 = pneg %p1249_p9  ;;  %p1256_p10 = por %p1255_p0, %p1254_p6 }
  0xa4   : > { %p1257_p11 = pnand %p1256_p10, %p1250_p12 }
  0xa6   : > { %1260 = shalt.err (!%p1257_p11)
}
  0xa7   : > { %1041 = dma.hbm_to_vmem [thread:$0]  (!%p1480_p13), %s1628_s30, 768, %s1656_s19, %s1552_s16, %s2022_s9, %s2022_s9, %s2021_s23  }
  0xa8   : > { %s2024_s11 = sshll.u32 %s1369_s24, 8  ;;  %s2025_s8 = sshll.u32 %s1472_s10, 4 }
  0xa9   : > { %s1688_s0 = scalar_lea.hbm %s1982_s5, %s2024_s11  ;;  %s340_s18 = scalar_lea.vmem [#allocation11], %s2025_s8 }
  0xaa   : > { %s347_s14 = sshll.u32 %s340_s18, 4  ;;  %s337_s17 = scalar_lea.sflag [#allocation12], %s1472_s10  ;;  %s1692_s14 = int_to_ptr.vmem [resolvable:$true] %s347_s14 }
  0xab   : > { %s1261_s27 = scalar_lea.hbm %s1688_s0, 256  ;;  %s1266_s19 = scalar_lea.hbm %s1982_s5, 512 }
  0xac   : > { %p1262_p8 = scmp.ne.s32.totalorder %s1688_s0, %s1261_s27  ;;  %p1267_p5 = scmp.lt.u32.totalorder %s1688_s0, %s1982_s5 }
  0xad   : > { %p1268_p1 = scmp.lt.u32.totalorder %s1266_s19, %s1261_s27  ;;  %p1270_p9 = scmp.lt.u32.totalorder %s1261_s27, %s1688_s0 }
  0xae   : > { %p1264_p4 = pnand %p1262_p8, %p1503_p2 }
  0xaf   : > { %p1269_p7 = por %p1268_p1, %p1267_p5 }
  0xb0   : > { %p1265_p3 = pneg %p1264_p4 }
  0xb1   : > { %p1271_p12 = por %p1270_p9, %p1269_p7 }
  0xb3   : > { %p1272_p6 = pnand %p1271_p12, %p1265_p3 }
  0xb5   : > { %1275 = shalt.err (!%p1272_p6)
}
  0xb6   : > { %s1276_s3 = scalar_lea.vmem %s1692_s14, 256  ;;  %s1378_s12 = smov [#allocation11]  }
  0xb7   : > { %p1277_p0 = scmp.ne.s32.totalorder %s1692_s14, %s1276_s3  ;;  %s1281_s20 = sshll.u32 %s1378_s12, 4  ;;  %s1282_s20 = int_to_ptr.vmem [resolvable:$false] %s1281_s20 }
  0xb8   : > { %s1283_s1 = scalar_lea.vmem %s1282_s20, 512  ;;  %p1284_p8 = scmp.lt.s32.totalorder %s1692_s14, %s1282_s20 }
  0xb9   : > { %p1279_p10 = pnand %p1277_p0, %p1503_p2  ;;  %p1285_p4 = scmp.lt.s32.totalorder %s1283_s1, %s1276_s3 }
  0xbb   : > { %p1280_p11 = pneg %p1279_p10  ;;  %p1286_p5 = por %p1285_p4, %p1284_p8 }
  0xbd   : > { %p1287_p1 = pnand %p1286_p5, %p1280_p11 }
  0xbf   : > { %1290 = shalt.err (!%p1287_p1)
}
  0xc0   : > { %1044 = dma.hbm_to_vmem [thread:$0]  (!%p1480_p13), %s1688_s0, 256, %s1692_s14, %s337_s17, %s2022_s9, %s2022_s9, %s2021_s23  }
  0xc1   : > { %p2026_p2 = scmp.ne.s32.totalorder %s2018_s29, 0 }
  0xc2   : > { %s1724_s28 = sand.u32 (!%p2026_p2), 1, %s1361_s22   ;;  %p2027_p3 = scmp.ne.s32.totalorder (!%p2026_p2), %s2009_s7, 0 }
  0xc3   : > { %359 = sbr.rel (%p2026_p2) target bundleno = 598 (0x256), region = 44  ;;  %s362_s26 = scalar_lea.sflag (!%p2026_p2), [#allocation3], %s1724_s28 }
  0xc4   : > { %s1007_s11 = smul.u32 (!%p2026_p2), 48, %s1724_s28 }
  0xc6   : > { %s1728_s13 = scalar_lea.vmem (!%p2026_p2), [#allocation2], %s1007_s11 }
  0xca   : > { %1336 = dma.done.wait (%p2027_p3), %s362_s26, 768  }
  0xcb   : > { %1338 = vsyncadd (%p2027_p3), %s362_s26, 4294966528  ;;  %s370_s10 = sand.u32 1, %s1438_s25   ;;  %s374_s23 = scalar_lea.vmem [#allocation5], %s1007_s11 }
  0xcc   : > { %s371_s29 = scalar_lea.sflag [#allocation6], %s370_s10 }
  0xcd   : > { %1340 = dma.done.wait (%p2027_p3), %s371_s29, 1536  }
  0xce   : > { %1342 = vsyncadd (%p2027_p3), %s371_s29, 4294965760  ;;  %s984_s9 = sshll.u32 %s1724_s28, 4  ;;  %s1740_s15 = scalar_lea.vmem [#allocation7], %s1007_s11 }
  0xcf   : > { %s389_s0 = scalar_lea.sflag [#allocation9], %s370_s10  ;;  %s392_s8 = scalar_lea.vmem [#allocation8], %s984_s9 }
  0xd0   : > { %1344 = dma.done.wait (%p2027_p3), %s389_s0, 1024  }
  0xd1   : > { %1346 = vsyncadd (%p2027_p3), %s389_s0, 4294966272  ;;  %s1746_s18 = scalar_lea.vmem [#allocation10], %s1007_s11  ;;  %s407_s14 = scalar_lea.sflag [#allocation12], %s1724_s28 }
  0xd2   : > { %s410_s17 = scalar_lea.vmem [#allocation11], %s984_s9 }
  0xd3   : > { %1348 = dma.done.wait (%p2027_p3), %s407_s14, 256  }
  0xd4   : > { %1350 = vsyncadd (%p2027_p3), %s407_s14, 4294967040  ;;  %v492_v0 = vlaneseq  ;;  %s1379_s27 = smov 127   ;;  %v1758_v2 = vld [vmem:[%s392_s8 + $0x8] sm:$0xff]  ;;  %v1760_v3 = vld [vmem:[%s392_s8] sm:$0xff]  ;;  %s2028_s7 = sld [smem:[#allocation23_spill]] }
  0xd5   : > { %599 = vrot.lane.b32.xlu1 %v1758_v2, %s1379_s27  ;;  %v1766_v4 = vld [vmem:[%s410_s17] sm:$0xff]  ;;  %v1768_v5 = vld [vmem:[%s374_s23 + $0x8] sm:$0xff]  ;;  %v1772_v7 = vld [vmem:[%s374_s23 + $0x18] sm:$0xff]  ;;  %s986_s16 = sshll.u32 %s1724_s28, 3  ;;  %s994_s30 = sshll.u32 %s1438_s25, 7 }
  0xd6   : > { %v1754_v1 = vand.u32 127, %v492_v0  ;;  %v1770_v6 = vld [vmem:[%s410_s17 + $0x8] sm:$0xff]  ;;  %v668_v9 = vadd.f32 %v1772_v7, %v1768_v5  ;;  %v470_v10 = vld [vmem:[%s374_s23] sm:$0xff]  ;;  %v472_v11 = vld [vmem:[%s374_s23 + $0x10] sm:$0xff]  ;;  %s463_s6 = scalar_lea.vmem [#allocation13], %s986_s16  ;;  %s2029_s11 = sld [smem:[#allocation28_spill]] }
  0xd7   : > { %v1774_v8 = vld [vmem:[%s374_s23 + $0x28] sm:$0xff]  ;;  %v1778_v12 = vld [vmem:[%s374_s23 + $0x20] sm:$0xff]  ;;  %v666_v13 = vadd.f32 %v472_v11, %v470_v10  ;;  %v467_v16 = vld [vmem:[%s1728_s13 + $0x18] sm:$0xff]  ;;  %s791_s21 = sshll.u32 %s463_s6, 4  ;;  %s1381_s25 = smov [#allocation13]   ;;  %s1935_s21 = int_to_ptr.vmem [resolvable:$true] %s791_s21 }
  0xd8   : > { %497 = vrot.lane.b32.xlu0 %v1754_v1, %s1379_s27  ;;  %v465_v14 = vld [vmem:[%s1728_s13 + $0x8] sm:$0xff]  ;;  %v669_v15 = vadd.f32 %v668_v9, %v1774_v8  ;;  %v464_v21 = vld [vmem:[%s1728_s13] sm:$0xff]  ;;  %v466_v22 = vld [vmem:[%s1728_s13 + $0x10] sm:$0xff]  ;;  %s1291_s10 = scalar_lea.vmem %s1935_s21, 128  ;;  %s1295_s29 = sshll.u32 %s1381_s25, 4  ;;  %s1296_s29 = int_to_ptr.vmem [resolvable:$false] %s1295_s29 }
  0xd9   : > { %617 = vrot.lane.b32.xlu1 %v1766_v4, %s1379_s27  ;;  %v1788_v17 = vld [vmem:[%s1728_s13 + $0x28] sm:$0xff]  ;;  %v667_v18 = vadd.f32 %v666_v13, %v1778_v12  ;;  %v661_v19 = vadd.f32 %v467_v16, %v465_v14  ;;  %v1801_v25 = vld [vmem:[%s1746_s18] sm:$0xff]  ;;  %v659_v31 = vadd.f32 %v466_v22, %v464_v21  ;;  %v484_v32 = vld [vmem:[%s1746_s18 + $0x10] sm:$0xff]  ;;  %p1292_p13 = scmp.ne.s32.totalorder %s1935_s21, %s1291_s10  ;;  %s1297_s23 = scalar_lea.vmem %s1296_s29, 256 }
  0xda   : > { %v1791_v20 = vmul.f32 0.33333334, %v669_v15  ;;  %v468_v26 = vld [vmem:[%s1728_s13 + $0x20] sm:$0xff]  ;;  %v1808_v28 = vld [vmem:[%s1746_s18 + $0x8] sm:$0xff]  ;;  %v478_v33 = vld [vmem:[%s1740_s15 + $0x10] sm:$0xff]  ;;  %v543_v34 = vmul.f32 %v1766_v4, %v1801_v25  ;;  %v545_v41 = vmul.f32 %v1766_v4, %v484_v32  ;;  %s778_s13 = scalar_lea.sflag [#allocation4], %s1724_s28  ;;  %p1298_p6 = scmp.lt.s32.totalorder %s1935_s21, %s1296_s29 }
  0xdb   : > { %v1795_v23 = vmul.f32 0.33333334, %v667_v18  ;;  %v662_v24 = vadd.f32 %v661_v19, %v1788_v17  ;;  %v1805_v27 = vld [vmem:[%s1740_s15] sm:$0xff]  ;;  %v1813_v29 = vld [vmem:[%s1740_s15 + $0x8] sm:$0xff]  ;;  %v660_v36 = vadd.f32 %v659_v31, %v468_v26  ;;  %v479_v37 = vld [vmem:[%s1740_s15 + $0x18] sm:$0xff]  ;;  %v544_v38 = vmul.f32 %v1770_v6, %v1808_v28  ;;  %p2030_p7 = scmp.ne.s32.totalorder %s2028_s7, 0  ;;  %p1299_p0 = scmp.lt.s32.totalorder %s1297_s23, %s1291_s10 }
  0xdc   : > { %597 = vrot.lane.b32.xlu0 %v1760_v3, %s1379_s27  ;;  %v525_v35 = vmul.f32 %v1760_v3, %v1805_v27  ;;  %v526_v39 = vmul.f32 %v1758_v2, %v1813_v29  ;;  %v485_v40 = vld [vmem:[%s1746_s18 + $0x18] sm:$0xff]  ;;  %v527_v42 = vmul.f32 %v1760_v3, %v478_v33  ;;  %v480_v44 = vld [vmem:[%s1740_s15 + $0x20] sm:$0xff]  ;;  %v1837_v45 = vld [vmem:[%s1740_s15 + $0x28] sm:$0xff]  ;;  %v528_v46 = vmul.f32 %v1758_v2, %v479_v37  ;;  %s1933_s26 = scalar_lea.hbm %s2029_s11, %s994_s30 }
  0xdd   : > { %672 = vrot.lane.b32.xlu1 %v1795_v23, %s1379_s27  ;;  %v1815_v30 = vmul.f32 0.33333334, %v662_v24  ;;  %v1833_v43 = vmul.f32 0.33333334, %v660_v36  ;;  %v549_v47 = vsub.f32 %v543_v34, %v470_v10  ;;  %v486_v49 = vld [vmem:[%s1746_s18 + $0x20] sm:$0xff]  ;;  %v546_v50 = vmul.f32 %v1770_v6, %v485_v40  ;;  %v487_v53 = vld [vmem:[%s1746_s18 + $0x28] sm:$0xff]  ;;  %p1293_p9 = pnand %p1292_p13, %p2030_p7  ;;  %p1300_p10 = por %p1299_p0, %p1298_p6 }
  0xde   : > { %v531_v48 = vsub.f32 %v525_v35, %v464_v21  ;;  %v550_v51 = vsub.f32 %v544_v38, %v1768_v5  ;;  %v532_v52 = vsub.f32 %v526_v39, %v465_v14  ;;  %v551_v54 = vsub.f32 %v545_v41, %v472_v11 }
  0xdf   : > { %v533_v55 = vsub.f32 %v527_v42, %v466_v22  ;;  %v529_v56 = vmul.f32 %v1760_v3, %v480_v44  ;;  %v530_v57 = vmul.f32 %v1758_v2, %v1837_v45  ;;  %v534_v58 = vsub.f32 %v528_v46, %v467_v16  ;;  %p1294_p12 = pneg %p1293_p9 }
  0xe0   : > { %619 = vrot.lane.b32.xlu0 %v1770_v6, %s1379_s27  ;;  %v547_v59 = vmul.f32 %v1766_v4, %v486_v49  ;;  %v555_v60 = vand.u32 2147483647, %v549_v47  ;;  %v537_v61 = vand.u32 2147483647, %v531_v48  ;;  %v548_v62 = vmul.f32 %v1770_v6, %v487_v53 }
  0xe1   : > { %706 = vrot.lane.b32.xlu1 %v1833_v43, %s1379_s27  ;;  %v552_v63 = vsub.f32 %v546_v50, %v1772_v7  ;;  %v556_v9 = vand.u32 2147483647, %v550_v51  ;;  %v538_v5 = vand.u32 2147483647, %v532_v52  ;;  %v557_v10 = vand.u32 2147483647, %v551_v54  ;;  %p1301_p11 = pnand %p1300_p10, %p1294_p12 }
  0xe2   : > { %v539_v13 = vand.u32 2147483647, %v533_v55  ;;  %v535_v11 = vsub.f32 %v529_v56, %v468_v26  ;;  %v536_v14 = vsub.f32 %v530_v57, %v1788_v17  ;;  %v540_v15 = vand.u32 2147483647, %v534_v58 }
  0xe3   : > { %v553_v18 = vsub.f32 %v547_v59, %v1778_v12  ;;  %v558_v19 = vand.u32 2147483647, %v552_v63  ;;  %v554_v16 = vsub.f32 %v548_v62, %v1774_v8  ;;  %v561_v21 = vadd.f32 %v555_v60, %v537_v61 }
  0xe4   : > { %674 = vrot.lane.b32.xlu0 %v1791_v20, %s1379_s27  ;;  %v562_v22 = vadd.f32 %v556_v9, %v538_v5  ;;  %v541_v24 = vand.u32 2147483647, %v535_v11  ;;  %v542_v31 = vand.u32 2147483647, %v536_v14  ;;  %v563_v34 = vadd.f32 %v557_v10, %v539_v13 }
  0xe5   : > { %v559_v35 = vand.u32 2147483647, %v553_v18  ;;  %v564_v7 = vadd.f32 %v558_v19, %v540_v15  ;;  %v573_v36 = vsub.f32 %v1805_v27, %v1801_v25  ;;  %v574_v26 = vsub.f32 %v1813_v29, %v1808_v28 }
  0xe6   : > { %v560_v17 = vand.u32 2147483647, %v554_v16  ;;  %v567_v38 = vmul.f32 8.138021e-05, %v561_v21  ;;  %v575_v39 = vsub.f32 %v478_v33, %v484_v32  ;;  %v576_v12 = vsub.f32 %v479_v37, %v485_v40 }
  0xe7   : > { %v568_v41 = vmul.f32 8.138021e-05, %v562_v22  ;;  %v577_v42 = vsub.f32 %v480_v44, %v486_v49  ;;  %v579_v8 = vand.u32 2147483647, %v573_v36  ;;  %v580_v46 = vand.u32 2147483647, %v574_v26 }
  0xe8   : > { %708 = vrot.lane.b32.xlu0 %v1815_v30, %s1379_s27  ;;  %v569_v47 = vmul.f32 8.138021e-05, %v563_v34  ;;  %v581_v48 = vand.u32 2147483647, %v575_v39  ;;  %v582_v50 = vand.u32 2147483647, %v576_v12  ;;  %v565_v51 = vadd.f32 %v559_v35, %v541_v24 }
  0xe9   : > { %v570_v52 = vmul.f32 8.138021e-05, %v564_v7  ;;  %v583_v54 = vand.u32 2147483647, %v577_v42  ;;  %v585_v55 = vmul.f32 8.138021e-07, %v579_v8  ;;  %v578_v25 = vsub.f32 %v1837_v45, %v487_v53 }
  0xea   : > { %v586_v27 = vmul.f32 8.138021e-07, %v580_v46  ;;  %v587_v56 = vmul.f32 8.138021e-07, %v581_v48  ;;  %v588_v28 = vmul.f32 8.138021e-07, %v582_v50  ;;  %v566_v33 = vadd.f32 %v560_v17, %v542_v31 }
  0xeb   : > { %v591_v29 = vadd.f32 %v585_v55, %v567_v38  ;;  %v571_v37 = vmul.f32 8.138021e-05, %v565_v51  ;;  %v584_v40 = vand.u32 2147483647, %v578_v25  ;;  %v589_v44 = vmul.f32 8.138021e-07, %v583_v54 }
  0xec   : > { %v592_v57 = vadd.f32 %v586_v27, %v568_v41  ;;  %v593_v32 = vadd.f32 %v587_v56, %v569_v47  ;;  %v594_v49 = vadd.f32 %v588_v28, %v570_v52  ;;  %v572_v60 = vmul.f32 8.138021e-05, %v566_v33 }
  0xed   : > { %v590_v61 = vmul.f32 8.138021e-07, %v584_v40  ;;  %v595_v62 = vadd.f32 %v589_v44, %v571_v37  ;;  %v495_v53 = vshrl.u32 %v492_v0, 7  ;;  %v607_v16 = vrot.slane %v1760_v3, 1 }
  0xee   : > { %v750_v58 = vadd.f32 %v592_v57, %v591_v29  ;;  %v608_v21 = vrot.slane %v1758_v2, 1  ;;  %v627_v22 = vrot.slane %v1766_v4, 1  ;;  %v628_v24 = vrot.slane %v1770_v6, 1 }
  0xef   : > { %v596_v9 = vadd.f32 %v590_v61, %v572_v60  ;;  %v496_v10 = vadd.s32 8, %v495_v53  ;;  %v506_v13 = vrot.slane %v495_v53, 1  ;;  %vm508_vm0 = vcmp.lt.s32.totalorder %v495_v53, 7 }
  0xf0   : > { %v751_v59 = vadd.f32 %v750_v58, %v593_v32  ;;  %v689_v0 = vrot.slane %v1791_v20, 1  ;;  %v688_v34 = vrot.slane %v1795_v23, 1  ;;  %v609_v7 = vsel %vm508_vm0, %v607_v16, %v608_v21 }
  0xf1   : > { %v507_v11 = vrot.slane %v496_v10, 1  ;;  %v629_v36 = vsel %vm508_vm0, %v627_v22, %v628_v24  ;;  %v610_v17 = vsel %vm508_vm0, %v608_v21, %v607_v16  ;;  %v630_v38 = vsel %vm508_vm0, %v628_v24, %v627_v22 }
  0xf2   : > { %v752_v63 = vadd.f32 %v751_v59, %v594_v49  ;;  %v690_v12 = vsel %vm508_vm0, %v688_v34, %v689_v0  ;;  %v611_v41 = vsub.f32 %v609_v7, %v1760_v3  ;;  %v631_v42 = vsub.f32 %v629_v36, %v1766_v4 }
  0xf3   : > { %v509_v14 = vsel %vm508_vm0, %v506_v13, %v507_v11  ;;  %v510_v15 = vsel %vm508_vm0, %v507_v11, %v506_v13  ;;  %v612_v8 = vsub.f32 %v610_v17, %v1758_v2  ;;  %v632_v46 = vsub.f32 %v630_v38, %v1770_v6 }
  0xf4   : > { %v753_v5 = vadd.f32 %v752_v63, %v595_v62  ;;  %v511_v18 = vsub.s32 %v509_v14, %v495_v53  ;;  %v512_v19 = vsub.s32 %v510_v15, %v496_v10  ;;  %v723_v47 = vrot.slane %v1815_v30, 1 }
  0xf5   : > { %v691_v48 = vsel %vm508_vm0, %v689_v0, %v688_v34  ;;  %v692_v50 = vsub.f32 %v690_v12, %v1795_v23  ;;  %v722_v51 = vrot.slane %v1833_v43, 1  ;;  %v613_v52 = vand.u32 2147483647, %v611_v41 }
  0xf6   : > { %v754_v45 = vadd.f32 %v753_v5, %v596_v9  ;;  %v514_v31 = vsub.s32 0, %v511_v18  ;;  %v517_v35 = vsub.s32 0, %v512_v19  ;;  %v633_v54 = vand.u32 2147483647, %v631_v42 }
  0xf7   : > { %v1380_v55 = vmov 0.0   ;;  %v693_v27 = vsub.f32 %v691_v48, %v1791_v20  ;;  %v614_v56 = vand.u32 2147483647, %v612_v8  ;;  %v634_v28 = vand.u32 2147483647, %v632_v46 }
  0xf8   : > { %v989_v26 = vmin.u32 %v514_v31, %v511_v18  ;;  %v990_v39 = vmin.u32 %v517_v35, %v512_v19  ;;  %v694_v57 = vand.u32 2147483647, %v692_v50  ;;  %v724_v33 = vsel %vm508_vm0, %v722_v51, %v723_v47 }
  0xf9   : > { %v725_v49 = vsel %vm508_vm0, %v723_v47, %v722_v51  ;;  %v695_v58 = vand.u32 2147483647, %v693_v27  ;;  %v726_v63 = vsub.f32 %v724_v33, %v1833_v43 }
  0xfa   : > { %vm519_vm1 = vcmp.eq.s32.totalorder %v989_v26, 1  ;;  %vm520_vm2 = vcmp.eq.s32.totalorder %v990_v39, 1  ;;  %v727_v9 = vsub.f32 %v725_v49, %v1815_v30 }
  0xfb   : > { %v991_v25 = vsel %vm519_vm1, 1.0, %v1380_v55  ;;  %v992_v29 = vsel %vm520_vm2, 1.0, %v1380_v55  ;;  %v728_v18 = vand.u32 2147483647, %v726_v63 }
  0xfc   : > { %v1884_v37 = vmul.f32 %v991_v25, %v613_v52  ;;  %v1886_v40 = vmul.f32 %v991_v25, %v633_v54  ;;  %v1890_v59 = vmul.f32 %v992_v29, %v614_v56  ;;  %v1892_v60 = vmul.f32 %v992_v29, %v634_v28 }
  0xfd   : > { %v696_v62 = vmul.f32 %v991_v25, %v694_v57  ;;  %v697_v11 = vmul.f32 %v992_v29, %v695_v58  ;;  %v729_v19 = vand.u32 2147483647, %v727_v9  ;;  %v730_v7 = vmul.f32 %v991_v25, %v728_v18 }
  0xfe   : > { %v1898_v10 = vadd.f32 %v1886_v40, %v1884_v37  ;;  %v1904_v14 = vadd.f32 %v1892_v60, %v1890_v59 }
  0xff   : > { %v698_v15 = vmax.f32 %v696_v62, 0.01  ;;  %v699_v34 = vmax.f32 %v697_v11, 0.01  ;;  %v731_v17 = vmul.f32 %v992_v29, %v729_v19  ;;  %v732_v48 = vmax.f32 %v730_v7, 0.01 }
 0x100   : > { %v649_v24 = vmul.f32 -10.0, %v1898_v10  ;;  %v650_v35 = vmul.f32 -10.0, %v1904_v14 }
 0x101   : > { %1087 = vrcp.f32 %v698_v15  ;;  %v733_v54 = vmax.f32 %v731_v17, 0.01 }
 0x102   : > { %v651_v12 = vmul.f32 1.442695, %v649_v24  ;;  %1089 = vrcp.f32 %v699_v34  ;;  %v653_v47 = vmul.f32 1.442695, %v650_v35 }
 0x104   : > { %1091 = vpow2.f32 %v651_v12 }
 0x105   : > { %755 = vadd.xlane.f32.xlu1 %v754_v45  ;;  %1093 = vpow2.f32 %v653_v47 }
 0x106   : > { %1095 = vrcp.f32 %v732_v48 }
 0x107   : > { %1097 = vrcp.f32 %v733_v54 }
 0x147   : > { %v600_v5 = vpop.permute.xlu1 %599 }
 0x148   : > { %v602_v53 = vsub.f32 %v600_v5, %v1758_v2 }
 0x14a   : > { %v498_v32 = vpop.permute.xlu0 %497  ;;  %v604_v16 = vand.u32 2147483647, %v602_v53 }
 0x14b   : > { %v499_v44 = vsub.s32 %v498_v32, %v1754_v1  ;;  %v618_v21 = vpop.permute.xlu1 %617 }
 0x14c   : > { %v621_v2 = vsub.f32 %v618_v21, %v1766_v4 }
 0x14d   : > { %v501_v61 = vsub.s32 0, %v499_v44 }
 0x14e   : > { %v598_v45 = vpop.permute.xlu0 %597  ;;  %v623_v36 = vand.u32 2147483647, %v621_v2 }
 0x14f   : > { %v987_v1 = vmin.u32 %v501_v61, %v499_v44  ;;  %v601_v13 = vsub.f32 %v598_v45, %v1760_v3  ;;  %v673_v46 = vpop.permute.xlu1 %672  ;;  %v1088_v61 = vpop.eup %1087 }
 0x150   : > { %v1090_v9 = vpop.eup %1089 }
 0x151   : > { %vm503_vm3 = vcmp.eq.s32.totalorder %v987_v1, 1  ;;  %v603_v0 = vand.u32 2147483647, %v601_v13  ;;  %v1092_v45 = vpop.eup %1091  ;;  %v703_v21 = vmul.f32 %v1090_v9, %v1892_v60 }
 0x152   : > { %v620_v22 = vpop.permute.xlu0 %619  ;;  %v988_v31 = vsel %vm503_vm3, 1.0, %v1380_v55  ;;  %v1094_v53 = vpop.eup %1093 }
 0x153   : > { %v622_v3 = vsub.f32 %v620_v22, %v1770_v6  ;;  %v1910_v38 = vmul.f32 %v988_v31, %v604_v16  ;;  %v1912_v41 = vmul.f32 %v988_v31, %v603_v0  ;;  %v625_v42 = vmul.f32 %v988_v31, %v623_v36  ;;  %v707_v33 = vpop.permute.xlu1 %706  ;;  %v1096_v13 = vpop.eup %1095 }
 0x154   : > { %v676_v6 = vsub.f32 %v673_v46, %v1795_v23  ;;  %v710_v58 = vsub.f32 %v707_v33, %v1833_v43  ;;  %v1098_v11 = vpop.eup %1097  ;;  %v655_v43 = vmul.f32 %v1092_v45, %v1898_v10  ;;  %v656_v18 = vmul.f32 %v1094_v53, %v1904_v14 }
 0x155   : > { %v624_v26 = vand.u32 2147483647, %v622_v3  ;;  %v637_v50 = vadd.f32 %v625_v42, %v1912_v41  ;;  %v737_v7 = vmul.f32 %v1098_v11, %v1890_v59  ;;  %v736_v17 = vmul.f32 %v1096_v13, %v1884_v37 }
 0x156   : > { %v675_v39 = vpop.permute.xlu0 %674  ;;  %v678_v55 = vand.u32 2147483647, %v676_v6  ;;  %v712_v63 = vand.u32 2147483647, %v710_v58 }
 0x157   : > { %v626_v8 = vmul.f32 %v988_v31, %v624_v26  ;;  %v677_v4 = vsub.f32 %v675_v39, %v1791_v20  ;;  %v641_v27 = vmul.f32 -10.0, %v637_v50 }
 0x158   : > { %v680_v29 = vmul.f32 %v988_v31, %v678_v55  ;;  %v714_v5 = vmul.f32 %v988_v31, %v712_v63 }
 0x159   : > { %v638_v51 = vadd.f32 %v626_v8, %v1910_v38  ;;  %v679_v52 = vand.u32 2147483647, %v677_v4  ;;  %v643_v23 = vmul.f32 1.442695, %v641_v27 }
 0x15a   : > { %v709_v25 = vpop.permute.xlu0 %708  ;;  %v682_v44 = vmax.f32 %v680_v29, 0.01  ;;  %v716_v1 = vmax.f32 %v714_v5, 0.01 }
 0x15b   : > { %v642_v56 = vmul.f32 -10.0, %v638_v51  ;;  %v681_v28 = vmul.f32 %v988_v31, %v679_v52  ;;  %v711_v20 = vsub.f32 %v709_v25, %v1815_v30  ;;  %1099 = vpow2.f32 %v643_v23 }
 0x15d   : > { %v645_v57 = vmul.f32 1.442695, %v642_v56  ;;  %v683_v32 = vmax.f32 %v681_v28, 0.01  ;;  %v713_v49 = vand.u32 2147483647, %v711_v20 }
 0x15f   : > { %1101 = vpow2.f32 %v645_v57  ;;  %v715_v62 = vmul.f32 %v988_v31, %v713_v49  ;;  %v702_v31 = vmul.f32 %v1088_v61, %v1886_v40 }
 0x160   : > { %1103 = vrcp.f32 %v683_v32 }
 0x161   : > { %1105 = vrcp.f32 %v682_v44  ;;  %v717_v30 = vmax.f32 %v715_v62, 0.01 }
 0x163   : > { %1107 = vrcp.f32 %v717_v30 }
 0x164   : > { %1109 = vrcp.f32 %v716_v1 }
 0x165   : > { %v1100_v15 = vpop.eup %1099 }
 0x166   : > { %v647_v16 = vmul.f32 %v1100_v15, %v637_v50 }
 0x168   : > { %v657_v3 = vadd.f32 %v655_v43, %v647_v16 }
 0x169   : > { %v1102_v19 = vpop.eup %1101 }
 0x16a   : > { %v1104_v22 = vpop.eup %1103  ;;  %v648_v24 = vmul.f32 %v1102_v19, %v638_v51  ;;  %v740_v46 = vmul.f32 4.8828126e-05, %v657_v3 }
 0x16b   : > { %v1106_v0 = vpop.eup %1105  ;;  %v687_v2 = vmul.f32 %v1104_v22, %v626_v8 }
 0x16c   : > { %v658_v34 = vadd.f32 %v656_v18, %v648_v24  ;;  %v686_v35 = vmul.f32 %v1106_v0, %v625_v42 }
 0x16d   : > { %v1108_v36 = vpop.eup %1107  ;;  %v705_v26 = vadd.f32 %v703_v21, %v687_v2 }
 0x16e   : > { %v704_v10 = vadd.f32 %v702_v31, %v686_v35  ;;  %v721_v14 = vmul.f32 %v1108_v36, %v1910_v38  ;;  %v741_v39 = vmul.f32 4.8828126e-05, %v658_v34  ;;  %v1110_v60 = vpop.eup %1109 }
 0x16f   : > { %v743_v12 = vmul.f32 4.8828124e-06, %v705_v26  ;;  %v720_v4 = vmul.f32 %v1110_v60, %v1912_v41 }
 0x170   : > { %v739_v40 = vadd.f32 %v737_v7, %v721_v14  ;;  %v742_v8 = vmul.f32 4.8828124e-06, %v704_v10 }
 0x171   : > { %v738_v6 = vadd.f32 %v736_v17, %v720_v4  ;;  %v745_v47 = vadd.f32 %v743_v12, %v741_v39 }
 0x172   : > { %v747_v42 = vmul.f32 3.6621095e-05, %v739_v40  ;;  %v744_v48 = vadd.f32 %v742_v8, %v740_v46 }
 0x173   : > { %v746_v59 = vmul.f32 3.6621095e-05, %v738_v6 }
 0x174   : > { %v749_v50 = vadd.f32 %v747_v42, %v745_v47 }
 0x175   : > { %v748_v51 = vadd.f32 %v746_v59, %v744_v48 }
 0x177   : > { %v764_v52 = vadd.f32 %v749_v50, %v748_v51 }
 0x179   : > { %765 = vadd.xlane.f32.xlu0 %v764_v52 }
 0x192   : > { %v756_v38 = vpop.xlane.xlu1 %755 }
 0x193   : > { %v757_v37 = vrot.slane %v756_v38, 4 }
 0x195   : > { %v758_v54 = vadd.f32 %v757_v37, %v756_v38 }
 0x197   : > { %v759_v55 = vrot.slane %v758_v54, 2 }
 0x199   : > { %v760_v25 = vadd.f32 %v759_v55, %v758_v54 }
 0x19b   : > { %v761_v41 = vrot.slane %v760_v25, 1 }
 0x19d   : > { %v762_v27 = vadd.f32 %v761_v41, %v760_v25 }
 0x19f   : > { %1008 = vpush %v762_v27 }
 0x1d0   : > { %s1009_s19 = spop %1008 }
 0x206   : > { %v766_v56 = vpop.xlane.xlu0 %765 }
 0x207   : > { %v767_v28 = vrot.slane %v766_v56, 4 }
 0x209   : > { %v768_v20 = vadd.f32 %v767_v28, %v766_v56 }
 0x20b   : > { %v769_v29 = vrot.slane %v768_v20, 2 }
 0x20d   : > { %v770_v23 = vadd.f32 %v769_v29, %v768_v20 }
 0x20f   : > { %v771_v57 = vrot.slane %v770_v23, 1 }
 0x211   : > { %v772_v32 = vadd.f32 %v771_v57, %v770_v23 }
 0x213   : > { %1010 = vpush %v772_v32 }
 0x244   : > { %s1011_s3 = spop %1010 }
 0x245   : > { %s774_s12 = sadd.f32 %s1011_s3, %s1009_s19 }
 0x247   : > { %v775_v33 = vstv %s774_s12 }
 0x248   : > { %776 = vst [vmem:[%s463_s6] sm:$0xff] %v775_v33 }
 0x249   : > { %1304 = shalt.err (!%p1301_p11)
}
 0x24a   : > { %s1305_s28 = scalar_lea.hbm %s1933_s26, 128  ;;  %s1309_s0 = scalar_lea.hbm %s2029_s11, 256 }
 0x24b   : > { %p1306_p8 = scmp.ne.s32.totalorder %s1933_s26, %s1305_s28  ;;  %p1310_p1 = scmp.lt.u32.totalorder %s1933_s26, %s2029_s11 }
 0x24c   : > { %p1311_p2 = scmp.lt.u32.totalorder %s1309_s0, %s1305_s28  ;;  %p1313_p13 = scmp.lt.u32.totalorder %s1305_s28, %s1933_s26 }
 0x24d   : > { %p1307_p4 = pnand %p1306_p8, %p2030_p7 }
 0x24e   : > { %p1312_p3 = por %p1311_p2, %p1310_p1 }
 0x24f   : > { %p1308_p5 = pneg %p1307_p4 }
 0x250   : > { %p1314_p9 = por %p1313_p13, %p1312_p3 }
 0x252   : > { %p1315_p12 = pnand %p1314_p9, %p1308_p5 }
 0x254   : > { %1318 = shalt.err (!%p1315_p12)
}
 0x255   : > { %1024 = dma.vmem_to_hbm [thread:$0]  (%p2030_p7), %s1935_s21, 128, %s1933_s26, %s778_s13  }
 0x256 PF: > { %s2031_s14 = sld [smem:[#allocation19_spill]]  ;;  %s2032_s17 = sld [smem:[#allocation24_spill]] }
 0x257   : > { %p2034_p0 = scmp.ge.s32.totalorder %s1369_s24, 2 }
 0x25c   : > { %s803_s27 = sand.u32 1, %s2031_s14   ;;  %p2033_p6 = scmp.ne.s32.totalorder %s2032_s17, 0 }
 0x25d   : > { %s804_s16 = scalar_lea.sflag [#allocation4], %s803_s27 }
 0x25e   : > { %p1046_p10 = pnand %p2034_p0, %p2033_p6 }
 0x260   : > { %1352 = dma.done.wait (!%p1046_p10), %s804_s16, 128  }
 0x261   : > { %1354 = vsyncadd (!%p1046_p10), %s804_s16, 4294967168  ;;  %s2035_s24 = sld [smem:[#allocation21_spill]]  ;;  %s2036_s30 = sld [smem:[#allocation20_spill]] }
 0x262   : > { %s2037_s23 = sld [smem:[#allocation22_spill]]  ;;  %s2038_s21 = smov %s1361_s22 }
 0x267   : > { %p28_p11 = scmp.ge.s32.totalorder %s2035_s24, 4   ;;  %s2039_s22 = smov %s2036_s30 }
 0x269   :  { %30 = sbr.rel (!%p28_p11) target bundleno = 16 (0x10), region = 150 }
 0x270   :  { %809 = vsyncpa [#allocation3], 1 }
 0x271   :  { %811 = vsyncpa [#allocation3 + $0x1], 1 }
 0x272   :  { %812 = vsyncpa [#allocation6], 1 }
 0x273   :  { %814 = vsyncpa [#allocation6 + $0x1], 1 }
 0x274   :  { %815 = vsyncpa [#allocation9], 1 }
 0x275   :  { %817 = vsyncpa [#allocation9 + $0x1], 1 }
 0x276   :  { %818 = vsyncpa [#allocation12], 1 }
 0x277   :  { %820 = vsyncpa [#allocation12 + $0x1], 1 }
 0x278   :  { %821 = vsyncpa [#allocation4], 1 }
 0x279   :  { %823 = vsyncpa [#allocation4 + $0x1], 1 }

</bundles_post_ra>
